<compile_context>
chip_gen: v6e
topology: v6e:2x2x1
jax: 0.10.0
libtpu: 0.0.40
codegen_flags: <defaults>
</compile_context>

<pallas_src>
import functools
import math
from typing import NamedTuple

import jax
import jax.numpy as jnp
from jax.experimental import pallas as pl
from jax.experimental.pallas import tpu as pltpu


def _round_up(x: int, m: int) -> int:
    return (x + m - 1) // m * m


def _cdiv(a: int, b: int) -> int:
    return (a + b - 1) // b


class FFNParams(NamedTuple):
    w1: jax.Array   # [dm_p, df_p], compute dtype (bf16)
    b1: jax.Array   # [1, df_p], f32
    w2: jax.Array   # [df_p, dm_p], compute dtype (bf16)
    b2: jax.Array   # [1, dm_p], f32


class _FFNConfig(NamedTuple):
    tm: int
    tk: int
    m_pad: int
    use_scratch: bool
    vmem_limit: int


def prepare_ffn_params(w1, b1, w2, b2, *, compute_dtype=jnp.bfloat16) -> FFNParams:
    """Pad + cast parameters once (not per forward call).

    w1: [d_model, d_ff], w2: [d_ff, d_model] (stored [in, out]).
    Zero padding is exact for this FFN: padded x cols hit zero W1 rows, padded
    d_ff lanes give relu(0 + 0) = 0 against zero W2 rows, and padded output
    cols/rows are sliced off after the kernel.
    """
    d_model, d_ff = w1.shape
    dm_p = _round_up(d_model, 128)
    df_p = _round_up(d_ff, 128)
    w1_p = jnp.pad(w1, ((0, dm_p - d_model), (0, df_p - d_ff))).astype(compute_dtype)
    w2_p = jnp.pad(w2, ((0, df_p - d_ff), (0, dm_p - d_model))).astype(compute_dtype)
    b1_p = jnp.pad(b1.reshape(1, d_ff), ((0, 0), (0, df_p - d_ff))).astype(jnp.float32)
    b2_p = jnp.pad(b2.reshape(1, d_model), ((0, 0), (0, dm_p - d_model))).astype(jnp.float32)
    return FFNParams(w1_p, b1_p, w2_p, b2_p)


def ffn_kernel(x_ref, w1_ref, b1_ref, w2_ref, b2_ref, o_ref, acc_ref=None):
    k = pl.program_id(1)
    # f32 output -> accumulate directly into the resident output block.
    acc = o_ref if acc_ref is None else acc_ref

    @pl.when(k == 0)
    def _init():
        # Fold b2 into the accumulator init (not re-added every k step).
        acc[...] = jnp.broadcast_to(b2_ref[...], acc.shape)

    # First linear (bf16 MXU operands, f32 accumulation) + bias + ReLU.
    h = jnp.dot(x_ref[...], w1_ref[...], preferred_element_type=jnp.float32)
    h = jnp.maximum(h + b1_ref[...], 0.0)          # (tm, tk) + (1, tk)
    # Dropout: identity (eval mode).
    # TODO(synk): training-mode dropout would use pltpu.prng_seed/prng_random_bits.
    # Second linear: accumulate this d_ff chunk's contribution (bf16 MXU input).
    acc[...] += jnp.dot(h.astype(w2_ref.dtype), w2_ref[...],
                        preferred_element_type=jnp.float32)

    if acc_ref is not None:
        @pl.when(k == pl.num_programs(1) - 1)
        def _store():
            o_ref[...] = acc_ref[...].astype(o_ref.dtype)


def _select_config(M, dm_p, df_p, cdt_itemsize, out_itemsize, out_is_f32) -> _FFNConfig:
    try:
        vmem_cap = int(pltpu.get_tpu_info().vmem_capacity_bytes)
    except Exception:
        vmem_cap = 64 << 20                     # conservative (v7x-sized) fallback
    budget = int(vmem_cap * 0.70)               # headroom for Mosaic internal scratch
    vmem_limit = int(vmem_cap * 0.80)           # ~102 MiB on v5e/v6e, ~51 MiB on v7x

    use_scratch = not out_is_f32
    # Per row of tm: double-buffered x tile (compute dtype), double-buffered
    # out tile, plus (optional) f32 accumulator scratch.
    per_row = dm_p * (2 * cdt_itemsize + 2 * out_itemsize + (4 if use_scratch else 0))

    def weight_bytes(tk):
        # Double-buffered W1/W2 chunks + f32 biases (double-buffered).
        return 4 * dm_p * tk * cdt_itemsize + 2 * (tk + dm_p) * 4

    # Prefer full weight residency: single k step -> W1/W2 index maps are
    # constant, so each weight is DMA'd from HBM exactly once for the whole
    # kernel instead of once per row tile.
    tk = df_p
    min_rows_bytes = 256 * per_row
    if weight_bytes(tk) + min_rows_bytes > budget:
        # Fall back to K-tiling: largest 128-multiple divisor of df_p <= 512
        # (avoids tk-induced over-padding of d_ff).
        tk = (min(512, df_p) // 128) * 128
        while (df_p % tk) or (weight_bytes(tk) + min_rows_bytes > budget and tk > 128):
            tk -= 128

    # Largest row tile that fits the remaining budget (multiple of 8, capped).
    tm_cap = (budget - weight_bytes(tk)) // per_row
    tm_cap = max(8, min(1024, (tm_cap // 8) * 8))

    # Balanced row tiles; keep >= 2 "parallel" grid steps so v7x's two
    # TensorCores both get work.
    n_row = max(1, _cdiv(M, tm_cap))
    if M >= 16:
        n_row = max(n_row, 2)
    tm = _round_up(_cdiv(M, n_row), 8)
    m_pad = _round_up(M, tm)
    return _FFNConfig(tm, tk, m_pad, use_scratch, vmem_limit)


@functools.partial(jax.jit, static_argnames=("cfg",))
def _ffn_pallas(x2d, w1_p, b1_p, w2_p, b2_p, cfg: _FFNConfig):
    M, d_model = x2d.shape
    dm_p, df_p = w1_p.shape
    tm, tk, m_pad, use_scratch, vmem_limit = cfg

    # Only x is padded per call (weights are pre-padded); cast to the MXU
    # compute dtype so x DMA bytes are halved too.
    x_p = jnp.pad(x2d, ((0, m_pad - M), (0, dm_p - d_model))).astype(w1_p.dtype)

    grid = (m_pad // tm, df_p // tk)
    scratch = [pltpu.VMEM((tm, dm_p), jnp.float32)] if use_scratch else []

    out = pl.pallas_call(
        ffn_kernel,
        out_shape=jax.ShapeDtypeStruct((m_pad, dm_p), x2d.dtype),
        grid_spec=pltpu.PrefetchScalarGridSpec(
            num_scalar_prefetch=0,
            grid=grid,
            in_specs=[
                pl.BlockSpec((tm, dm_p), lambda i, k: (i, 0)),   # x rows
                pl.BlockSpec((dm_p, tk), lambda i, k: (0, k)),   # W1 (resident if tk==df_p)
                pl.BlockSpec((1, tk), lambda i, k: (0, k)),      # b1 chunk
                pl.BlockSpec((tk, dm_p), lambda i, k: (k, 0)),   # W2 chunk
                pl.BlockSpec((1, dm_p), lambda i, k: (0, 0)),    # b2
            ],
            out_specs=pl.BlockSpec((tm, dm_p), lambda i, k: (i, 0)),
            scratch_shapes=scratch,
        ),
        compiler_params=pltpu.CompilerParams(
            dimension_semantics=("parallel", "arbitrary"),
            vmem_limit_bytes=vmem_limit,
        ),
    )(x_p, w1_p, b1_p, w2_p, b2_p)

    return out[:M, :d_model]


def feed_forward_block(x, params: FFNParams):
    """Apply the FFN.  x: [..., d_model]."""
    *lead, d_model = x.shape
    M = math.prod(lead) if lead else 1
    dm_p, df_p = params.w1.shape
    cfg = _select_config(
        M, dm_p, df_p,
        cdt_itemsize=jnp.dtype(params.w1.dtype).itemsize,
        out_itemsize=jnp.dtype(x.dtype).itemsize,
        out_is_f32=(x.dtype == jnp.float32),
    )
    out2d = _ffn_pallas(x.reshape(M, d_model), params.w1, params.b1,
                        params.w2, params.b2, cfg)
    return out2d.reshape(*lead, d_model)


def reference_ffn(x, w1, b1, w2, b2):
    h = jnp.maximum(jnp.einsum("...d,df->...f", x, w1) + b1, 0.0)
    return jnp.einsum("...f,fd->...d", h, w2) + b2


if __name__ == "__main__":
    # Small shapes consistent with the module's forward.
    batch, seq, d_model, d_ff = 2, 8, 32, 64

    key = jax.random.PRNGKey(0)
    kx, kw1, kb1, kw2, kb2 = jax.random.split(key, 5)

    x = jax.random.normal(kx, (batch, seq, d_model), dtype=jnp.float32)

    # Deterministic parameter init (Kaiming-uniform-ish like nn.Linear).
    lim1 = 1.0 / math.sqrt(d_model)
    lim2 = 1.0 / math.sqrt(d_ff)
    w1 = jax.random.uniform(kw1, (d_model, d_ff), minval=-lim1, maxval=lim1,
                            dtype=jnp.float32)   # stored [in, out]
    b1 = jax.random.uniform(kb1, (d_ff,), minval=-lim1, maxval=lim1,
                            dtype=jnp.float32)
    w2 = jax.random.uniform(kw2, (d_ff, d_model), minval=-lim2, maxval=lim2,
                            dtype=jnp.float32)   # stored [in, out]
    b2 = jax.random.uniform(kb2, (d_model,), minval=-lim2, maxval=lim2,
                            dtype=jnp.float32)

    # Pad + cast weights ONCE; per-call work only pads x.
    params = prepare_ffn_params(w1, b1, w2, b2, compute_dtype=jnp.bfloat16)

    out = feed_forward_block(x, params)
    out = jax.block_until_ready(out)

    ref = reference_ffn(x, w1, b1, w2, b2)
    assert out.shape == (batch, seq, d_model)
    # bf16 MXU operands with f32 accumulation -> relaxed tolerance vs f32 ref.
    max_err = float(jnp.max(jnp.abs(out - ref)))
    assert jnp.allclose(out, ref, atol=3e-2, rtol=3e-2), (
        f"mismatch vs reference, max abs diff {max_err}")

    print("KERNEL_OK")
</pallas_src>

<mosaic_0001>
module attributes {stable_mosaic.version = 11 : i64} {
  func.func @ffn_kernel(%arg0: i32, %arg1: i32, %arg2: memref<8x128xbf16, #tpu.memory_space<vmem>>, %arg3: memref<128x128xbf16, #tpu.memory_space<vmem>>, %arg4: memref<1x128xf32, #tpu.memory_space<vmem>>, %arg5: memref<128x128xbf16, #tpu.memory_space<vmem>>, %arg6: memref<1x128xf32, #tpu.memory_space<vmem>>, %arg7: memref<8x128xf32, #tpu.memory_space<vmem>>) attributes {dimension_semantics = [#tpu.dimension_semantics<parallel>, #tpu.dimension_semantics<arbitrary>], iteration_bounds = array<i64: 2, 1>, scalar_prefetch = 0 : i64, scratch_operands = 0 : i64, tpu.core_type = #tpu.core_type<tc>, window_params = [{transform_indices = @transform_0, window_bounds = array<i64: 8, 128>}, {transform_indices = @transform_1, window_bounds = array<i64: 128, 128>}, {transform_indices = @transform_2, window_bounds = array<i64: 1, 128>}, {transform_indices = @transform_3, window_bounds = array<i64: 128, 128>}, {pipeline_mode = #tpu.pipeline_mode<synchronous>, transform_indices = @transform_4, window_bounds = array<i64: 1, 128>}, {transform_indices = @transform_5, window_bounds = array<i64: 8, 128>}]} {
    %c0_i32 = arith.constant 0 : i32
    %0 = arith.cmpi eq, %arg1, %c0_i32 : i32
    %1 = arith.extui %0 : i1 to i32
    %c0_i32_0 = arith.constant 0 : i32
    %2 = arith.cmpi ne, %1, %c0_i32_0 : i32
    scf.if %2 {
      %c0_14 = arith.constant 0 : index
      %c0_15 = arith.constant 0 : index
      %17 = vector.load %arg6[%c0_14, %c0_15] : memref<1x128xf32, #tpu.memory_space<vmem>>, vector<1x128xf32>
      %18 = vector.shape_cast %17 : vector<1x128xf32> to vector<1x128xf32>
      %19 = vector.broadcast %18 : vector<1x128xf32> to vector<8x128xf32>
      %c0_16 = arith.constant 0 : index
      %c0_17 = arith.constant 0 : index
      %20 = vector.load %arg7[%c0_16, %c0_17] : memref<8x128xf32, #tpu.memory_space<vmem>>, vector<8x128xf32>
      tpu.vector_store %arg7[%c0_16, %c0_17], %19 {strides = array<i32>} : memref<8x128xf32, #tpu.memory_space<vmem>>, vector<8x128xf32>,
    } else {
    }
    %c0 = arith.constant 0 : index
    %c0_1 = arith.constant 0 : index
    %3 = vector.load %arg2[%c0, %c0_1] : memref<8x128xbf16, #tpu.memory_space<vmem>>, vector<8x128xbf16>
    %c0_2 = arith.constant 0 : index
    %c0_3 = arith.constant 0 : index
    %4 = vector.load %arg3[%c0_2, %c0_3] : memref<128x128xbf16, #tpu.memory_space<vmem>>, vector<128x128xbf16>
    %cst = arith.constant dense<0.000000e+00> : vector<8x128xf32>
    %5 = tpu.matmul %3, %4, %cst {dimension_numbers = #tpu.dot_dimension_numbers<[1], [0], [0], [1], [0, 0, 1, 1], [], []>} : vector<8x128xbf16>, vector<128x128xbf16>, vector<8x128xf32> -> vector<8x128xf32>
    %c0_4 = arith.constant 0 : index
    %c0_5 = arith.constant 0 : index
    %6 = vector.load %arg4[%c0_4, %c0_5] : memref<1x128xf32, #tpu.memory_space<vmem>>, vector<1x128xf32>
    %7 = vector.broadcast %6 : vector<1x128xf32> to vector<8x128xf32>
    %8 = arith.addf %5, %7 : vector<8x128xf32>
    %cst_6 = arith.constant 0.000000e+00 : f32
    %9 = vector.broadcast %cst_6 : f32 to vector<8x128xf32>
    %10 = arith.maximumf %8, %9 : vector<8x128xf32>
    %c0_7 = arith.constant 0 : index
    %c0_8 = arith.constant 0 : index
    %11 = vector.load %arg7[%c0_7, %c0_8] : memref<8x128xf32, #tpu.memory_space<vmem>>, vector<8x128xf32>
    %12 = arith.truncf %10 : vector<8x128xf32> to vector<8x128xbf16>
    %c0_9 = arith.constant 0 : index
    %c0_10 = arith.constant 0 : index
    %13 = vector.load %arg5[%c0_9, %c0_10] : memref<128x128xbf16, #tpu.memory_space<vmem>>, vector<128x128xbf16>
    %cst_11 = arith.constant dense<0.000000e+00> : vector<8x128xf32>
    %14 = tpu.matmul %12, %13, %cst_11 {dimension_numbers = #tpu.dot_dimension_numbers<[1], [0], [0], [1], [0, 0, 1, 1], [], []>} : vector<8x128xbf16>, vector<128x128xbf16>, vector<8x128xf32> -> vector<8x128xf32>
    %15 = arith.addf %11, %14 : vector<8x128xf32>
    %c0_12 = arith.constant 0 : index
    %c0_13 = arith.constant 0 : index
    %16 = vector.load %arg7[%c0_12, %c0_13] : memref<8x128xf32, #tpu.memory_space<vmem>>, vector<8x128xf32>
    tpu.vector_store %arg7[%c0_12, %c0_13], %15 {strides = array<i32>} : memref<8x128xf32, #tpu.memory_space<vmem>>, vector<8x128xf32>,
    return
  }
  func.func @transform_0(%arg0: i32, %arg1: i32) -> (i32, i32) {
    %c0_i32 = arith.constant 0 : i32
    %c0_i32_0 = arith.constant 0 : i32
    return %arg0, %c0_i32 : i32, i32
  }
  func.func @transform_1(%arg0: i32, %arg1: i32) -> (i32, i32) {
    %c0_i32 = arith.constant 0 : i32
    %c0_i32_0 = arith.constant 0 : i32
    return %c0_i32, %arg1 : i32, i32
  }
  func.func @transform_2(%arg0: i32, %arg1: i32) -> (i32, i32) {
    %c0_i32 = arith.constant 0 : i32
    %c0_i32_0 = arith.constant 0 : i32
    return %c0_i32, %arg1 : i32, i32
  }
  func.func @transform_3(%arg0: i32, %arg1: i32) -> (i32, i32) {
    %c0_i32 = arith.constant 0 : i32
    %c0_i32_0 = arith.constant 0 : i32
    return %arg1, %c0_i32 : i32, i32
  }
  func.func @transform_4(%arg0: i32, %arg1: i32) -> (i32, i32) {
    %c0_i32 = arith.constant 0 : i32
    %c0_i32_0 = arith.constant 0 : i32
    %c0_i32_1 = arith.constant 0 : i32
    return %c0_i32, %c0_i32_0 : i32, i32
  }
  func.func @transform_5(%arg0: i32, %arg1: i32) -> (i32, i32) {
    %c0_i32 = arith.constant 0 : i32
    %c0_i32_0 = arith.constant 0 : i32
    return %arg0, %c0_i32 : i32, i32
  }
}

</mosaic_0001>

<bundles_post_ra>
// kernel: _ffn_pallas.1
= control target key start
LH: loop header
LB: loop body
LE: loop exit
PB: predicated region body
PF: predicated region fallthrough
CT: control target
= control target key end

     0   :  { %10 = vsyncpa [#allocation3], 0  ;;  %s1169_s0 = inlined_call_operand.vmem [shape: bf16[16,128], index: 0, kind: input, shape index: {}]   ;;  %s1170_s1 = inlined_call_operand.hbm [shape: bf16[128,128], index: 1, kind: input, shape index: {}]   ;;  %s1171_s2 = inlined_call_operand.vmem [shape: f32[1,128], index: 2, kind: input, shape index: {}]   ;;  %s1172_s3 = inlined_call_operand.hbm [shape: bf16[128,128], index: 3, kind: input, shape index: {}]   ;;  %s1173_s4 = inlined_call_operand.vmem [shape: f32[1,128], index: 4, kind: input, shape index: {}]   ;;  %s1174_s5 = inlined_call_operand.hbm [shape: f32[16,128], index: 5, kind: output, shape index: {}]  }
   0x1   :  { %11 = vsyncpa [#allocation6], 0 }
   0x2   :  { %12 = vsyncpa [#allocation4], 0 }
   0x3   :  { %14 = vsyncpa [#allocation4 + $0x1], 0  ;;  %s1008_s18 = smov 0   ;;  %s1010_s19 = smov 0  }
   0x4   :  { %s1012_s20 = smov 0   ;;  %s1014_s21 = smov 0  }
   0x5   :  { %s1016_s22 = smov 0   ;;  %s1018_s23 = smov 0  }
   0x6 LB: > { %s645_s24 = sadd.s32 4294967295, %s969_s23   ;;  %s646_s25 = sadd.s32 4294967294, %s969_s23   ;;  %s969_s23 = sphi %s1018_s23, %s20_s23   ;;  %s965_s22 = sphi %s1016_s22, %s1187_s22   ;;  %s961_s21 = sphi %s1014_s21, %s1186_s21   ;;  %s957_s20 = sphi %s1012_s20, %s1185_s20   ;;  %s953_s19 = sphi %s1010_s19, %s1184_s19   ;;  %s949_s18 = sphi %s1008_s18, %s1183_s18  }
   0x7   : > { %s32_s26 = sadd.s32 1, %s965_s22  ;;  %s164_s27 = sadd.s32 1, %s957_s20 }
   0x8   : > { %p34_p0 = scmp.ge.s32.totalorder %s32_s26, 2  ;;  %p174_p1 = scmp.ne.s32.totalorder %s957_s20, %s953_s19 }
   0x9   : > { %p175_p2 = scmp.eq.s32.totalorder %s645_s24, 1  ;;  %p180_p3 = scmp.ne.s32.totalorder %s953_s19, %s949_s18 }
   0xa   : > { %s1189_s26 = smov (%p34_p0, %s32_s26), 0  ;;  %p181_p5 = scmp.eq.s32.totalorder %s646_s25, 1 }
   0xb   : > { %p1048_p4 = por %p175_p2, %p174_p1  ;;  %s161_s29 = ssub.s32 %s965_s22, %s1189_s26 }
   0xc   : > { %p647_p6 = scmp.ge.s32.totalorder %s969_s23, 1  ;;  %p162_p7 = scmp.eq.s32.totalorder %s161_s29, 0 }
   0xd   : > { %s1176_s28 = scalar_select %p1048_p4, 1, 0 }
   0xe   : > { %p1055_p8 = por %p181_p5, %p180_p3  ;;  %p188_p9 = scmp.lt.s32.totalorder %s969_s23, 3 }
   0xf   : > { %s1061_s6 = scalar_select %p162_p7, %s957_s20, %s164_s27  }
  0x10   : > { %s1177_s30 = scalar_select %p1055_p8, 1, 0 }
  0x11   : > { %p1063_p10 = pnand %p647_p6, %p188_p9  ;;  %p1067_p11 = scmp.eq.s32.totalorder %s645_s24, 0 }
  0x12   : > { %s971_s9 = smov [#allocation2]   ;;  %s972_s12 = smov [#allocation5]  }
  0x13   : > { %p747_p12 = pneg %p1063_p10  ;;  %s202_s10 = sshll.u32 %s971_s9, 4  ;;  %s203_s10 = int_to_ptr.vmem [resolvable:$true] %s202_s10 }
  0x14   : > { %s224_s13 = sshll.u32 %s972_s12, 4  ;;  %s844_s14 = scalar_lea.vmem %s203_s10, 1024  ;;  %s225_s13 = int_to_ptr.vmem [resolvable:$true] %s224_s13 }
  0x15   : > { %p1075_p13 = pnand %p1067_p11, %p747_p12  ;;  %p845_p1 = scmp.ne.s32.totalorder %s203_s10, %s844_s14 }
  0x16   : > { %p852_p5 = scmp.lt.s32.totalorder %s203_s10, %s203_s10  ;;  %p853_p6 = scmp.lt.s32.totalorder %s844_s14, %s844_s14 }
  0x17   : > { %p835_p0 = pneg %p1075_p13 }
  0x18   : > { %p854_p7 = por %p853_p6, %p852_p5 }
  0x19   : > { %p847_p2 = pnand %p845_p1, %p835_p0 }
  0x1b   : > { %p848_p3 = pneg %p847_p2 }
  0x1d   : > { %p855_p9 = pnand %p854_p7, %p848_p3 }
  0x1f   : > { %858 = shalt.err (!%p855_p9)
}
  0x20   : > { %s973_s15 = smov 64   ;;  %s974_s16 = smov 4  }
  0x21   : > { %750 = dma.hbm_to_vmem [thread:$0]  (!%p1075_p13), %s1170_s1, 1024, %s203_s10, [#allocation3], %s973_s15, %s973_s15, %s974_s16  }
  0x22   : > { %s870_s25 = scalar_lea.vmem %s225_s13, 1024  ;;  %p878_p8 = scmp.lt.s32.totalorder %s225_s13, %s225_s13 }
  0x23   : > { %p871_p12 = scmp.ne.s32.totalorder %s225_s13, %s870_s25  ;;  %p879_p4 = scmp.lt.s32.totalorder %s870_s25, %s870_s25 }
  0x25   : > { %p873_p1 = pnand %p871_p12, %p835_p0  ;;  %p880_p5 = por %p879_p4, %p878_p8 }
  0x27   : > { %p874_p2 = pneg %p873_p1 }
  0x29   : > { %p881_p3 = pnand %p880_p5, %p874_p2 }
  0x2b   : > { %884 = shalt.err (!%p881_p3)
}
  0x2c   : > { %753 = dma.hbm_to_vmem [thread:$0]  (!%p1075_p13), %s1172_s3, 1024, %s225_s13, [#allocation6], %s973_s15, %s973_s15, %s974_s16  }
  0x2d   : > { %250 = sbr.rel (%p1063_p10) target bundleno = 495 (0x1ef), region = 40 }
  0x32   : > { %936 = dma.done.wait (%p1067_p11), [#allocation3], 1024  }
  0x33   : > { %938 = vsyncadd (%p1067_p11), [#allocation3], 4294966272 }
  0x34   : > { %940 = dma.done.wait (%p1067_p11), [#allocation6], 1024  }
  0x35   : > { %942 = vsyncadd (%p1067_p11), [#allocation6], 4294966272  ;;  %v975_v0 = vmov 0.0   ;;  %vm976_vm0 = vmmov 0   ;;  %v817_v1 = vld [vmem:[#allocation2 + $0x38] sm:$0xff]   ;;  %v818_v2 = vld [vmem:[#allocation2 + $0x30] sm:$0xff]  }
  0x36   : > { %697 = vmatprep.subr.bf16.mxu0 %v975_v0  ;;  %713 = vmatprep.mubr.msk.bf16.mxu0 %vm976_vm0, %v975_v0  ;;  %v819_v3 = vld [vmem:[#allocation2 + $0x28] sm:$0xff]   ;;  %v825_v4 = vld [vmem:[#allocation5 + $0x38] sm:$0xff]   ;;  %v820_v5 = vld [vmem:[#allocation2 + $0x20] sm:$0xff]   ;;  %p284_p4 = scmp.lt.s32.totalorder %s961_s21, 1  ;;  %s281_s14 = sand.u32 1, %s953_s19  }
  0x37   : > { %717 = vmatprep.subr.bf16.mxu1 %v975_v0  ;;  %733 = vmatprep.mubr.msk.bf16.mxu1 %vm976_vm0, %v975_v0  ;;  %v826_v6 = vld [vmem:[#allocation5 + $0x30] sm:$0xff]   ;;  %v821_v7 = vld [vmem:[#allocation2 + $0x18] sm:$0xff]   ;;  %v827_v8 = vld [vmem:[#allocation5 + $0x28] sm:$0xff]   ;;  %s655_s15 = sshll.u32 %s281_s14, 3  ;;  %s676_s24 = sshll.u32 %s961_s21, 7 }
  0x38   : > { %698 = vmatpush3.bf16.msra.mxu0 %v817_v1  ;;  %718 = vmatpush3.bf16.msra.mxu1 %v825_v4  ;;  %v822_v9 = vld [vmem:[#allocation2 + $0x10] sm:$0xff]   ;;  %v828_v10 = vld [vmem:[#allocation5 + $0x20] sm:$0xff]   ;;  %s285_s7 = scalar_select %p284_p4, %s961_s21, 1  ;;  %v823_v11 = vld [vmem:[#allocation2 + $0x8] sm:$0xff]  }
  0x39   : > { %699 = vmatprep.subr.bf16.mxu0 %v975_v0  ;;  %719 = vmatprep.subr.bf16.mxu1 %v975_v0  ;;  %v829_v12 = vld [vmem:[#allocation5 + $0x18] sm:$0xff]   ;;  %v824_v13 = vld [vmem:[#allocation2] sm:$0xff]   ;;  %v830_v14 = vld [vmem:[#allocation5 + $0x10] sm:$0xff]   ;;  %s283_s25 = scalar_lea.vmem [#allocation7], %s655_s15  ;;  %s527_s9 = scalar_lea.sflag [#allocation4], %s281_s14 }
  0x3a   : > { %s656_s8 = sshll.u32 %s285_s7, 2  ;;  %v831_v16 = vld [vmem:[#allocation5 + $0x8] sm:$0xff]   ;;  %v832_v17 = vld [vmem:[#allocation5] sm:$0xff]   ;;  %s540_s27 = sshll.u32 %s283_s25, 4  ;;  %s1125_s27 = int_to_ptr.vmem [resolvable:$true] %s540_s27 }
  0x3b   : > { %s287_s11 = scalar_lea.vmem %s1169_s0, %s656_s8  ;;  %v658_v18 = vld [vmem:[%s1171_s2] ss:$0 sm:$0xff]  ;;  %s1123_s8 = scalar_lea.hbm %s1174_s5, %s676_s24 }
  0x3c   : > { %700 = vmatpush3.bf16.msra.mxu0 %v818_v2  ;;  %720 = vmatpush3.bf16.msra.mxu1 %v826_v6  ;;  %v305_v15 = vld [vmem:[%s287_s11] sm:$0xf]  ;;  %s885_s10 = scalar_lea.vmem %s1125_s27, 128  ;;  %p1181_p10 = scmp.ne.s32.totalorder %s1176_s28, 0 }
  0x3d   : > { %701 = vmatprep.subr.bf16.mxu0 %v975_v0  ;;  %721 = vmatprep.subr.bf16.mxu1 %v975_v0  ;;  %v657_v26 = vld [vmem:[%s1173_s4] ss:$0 sm:$0xff]  ;;  %p886_p8 = scmp.ne.s32.totalorder %s1125_s27, %s885_s10  ;;  %s977_s21 = smov [#allocation7]  }
  0x3e   : > { %s889_s11 = sshll.u32 %s977_s21, 4  ;;  %s890_s11 = int_to_ptr.vmem [resolvable:$false] %s889_s11 }
  0x3f   : > { %p887_p11 = pnand %p886_p8, %p1181_p10  ;;  %s891_s12 = scalar_lea.vmem %s890_s11, 256 }
  0x40   : > { %702 = vmatpush3.bf16.msra.mxu0 %v819_v3  ;;  %722 = vmatpush3.bf16.msra.mxu1 %v827_v8  ;;  %p892_p0 = scmp.lt.s32.totalorder %s1125_s27, %s890_s11  ;;  %p893_p6 = scmp.lt.s32.totalorder %s891_s12, %s885_s10 }
  0x41   : > { %703 = vmatprep.subr.bf16.mxu0 %v975_v0  ;;  %723 = vmatprep.subr.bf16.mxu1 %v975_v0  ;;  %p888_p13 = pneg %p887_p11 }
  0x42   : > { %p894_p7 = por %p893_p6, %p892_p0 }
  0x44   : > { %704 = vmatpush3.bf16.msra.mxu0 %v820_v5  ;;  %724 = vmatpush3.bf16.msra.mxu1 %v828_v10  ;;  %p895_p9 = pnand %p894_p7, %p888_p13 }
  0x45   : > { %705 = vmatprep.subr.bf16.mxu0 %v975_v0  ;;  %725 = vmatprep.subr.bf16.mxu1 %v975_v0 }
  0x48   : > { %706 = vmatpush3.bf16.msra.mxu0 %v821_v7  ;;  %726 = vmatpush3.bf16.msra.mxu1 %v829_v12 }
  0x49   : > { %707 = vmatprep.subr.bf16.mxu0 %v975_v0  ;;  %727 = vmatprep.subr.bf16.mxu1 %v975_v0 }
  0x4c   : > { %708 = vmatpush3.bf16.msra.mxu0 %v822_v9  ;;  %728 = vmatpush3.bf16.msra.mxu1 %v830_v14 }
  0x4d   : > { %709 = vmatprep.subr.bf16.mxu0 %v975_v0  ;;  %729 = vmatprep.subr.bf16.mxu1 %v975_v0 }
  0x50   : > { %710 = vmatpush3.bf16.msra.mxu0 %v823_v11  ;;  %730 = vmatpush3.bf16.msra.mxu1 %v831_v16 }
  0x51   : > { %711 = vmatprep.subr.bf16.mxu0 %v975_v0  ;;  %731 = vmatprep.subr.bf16.mxu1 %v975_v0 }
  0x54   : > { %712 = vmatpush3.bf16.msra.mxu0 %v824_v13  ;;  %732 = vmatpush3.bf16.msra.mxu1 %v832_v17 }
  0x57   : > { %714 = vmatmul.mubr.bf16.vlgmr.msra.gmra.mxu0 %v305_v15 }
 0x117   : > { %v411_v19 = vpop.f32.mrf.mxu0 }
 0x118   : > { %v412_v20 = vadd.f32 %v658_v18, %v411_v19 }
 0x119   : > { %v715_v21 = vpop.f32.mrf.mxu0 }
 0x11a   : > { %v417_v22 = vmax.f32 %v412_v20, 0.0 }
 0x11b   : > { %v414_v23 = vpop.f32.mrf.mxu0 }
 0x11c   : > { %v419_v24 = vpack.c.bf16 %v417_v22, %v417_v22 }
 0x11d   : > { %v716_v25 = vpop.f32.mrf.mxu0 }
 0x11e   : > { %734 = vmatmul.mubr.bf16.vlgmr.msra.gmra.mxu1 %v419_v24 }
 0x1de   : > { %v518_v27 = vpop.f32.mrf.mxu1 }
 0x1df   : > { %v524_v28 = vadd.f32 %v657_v26, %v518_v27 }
 0x1e0   : > { %v735_v29 = vpop.f32.mrf.mxu1 }
 0x1e1   : > { %525 = vst [vmem:[%s283_s25] sm:$0xff] %v524_v28 }
 0x1e2   : > { %v521_v30 = vpop.f32.mrf.mxu1 }
 0x1e3   : > { %898 = shalt.err (!%p895_p9)
}
 0x1e4   : > { %s899_s13 = scalar_lea.hbm %s1123_s8, 128  ;;  %s903_s16 = scalar_lea.hbm %s1174_s5, 256 }
 0x1e5   : > { %p900_p12 = scmp.ne.s32.totalorder %s1123_s8, %s899_s13  ;;  %p904_p5 = scmp.lt.s32.totalorder %s1123_s8, %s1174_s5 }
 0x1e6   : > { %p905_p3 = scmp.lt.s32.totalorder %s903_s16, %s899_s13 }
 0x1e7   : > { %p901_p1 = pnand %p900_p12, %p1181_p10 }
 0x1e8   : > { %p906_p4 = por %p905_p3, %p904_p5 }
 0x1e9   : > { %p902_p2 = pneg %p901_p1 }
 0x1eb   : > { %p907_p8 = pnand %p906_p4, %p902_p2 }
 0x1ed   : > { %910 = shalt.err (!%p907_p8)
}
 0x1ee   : > { %745 = dma.vmem_to_hbm [thread:$0]  (%p1181_p10), %s1125_s27, 128, %s1123_s8, %s527_s9   ;;  %v736_v31 = vpop.f32.mrf.mxu1 }
 0x1ef PF: > { %p762_p11 = scmp.ge.s32.totalorder %s969_s23, 2  ;;  %s552_s25 = sand.u32 1, %s949_s18  }
 0x1f0   : > { %p1182_p13 = scmp.ne.s32.totalorder %s1177_s30, 0  ;;  %s553_s29 = scalar_lea.sflag [#allocation4], %s552_s25 }
 0x1f2   : > { %p755_p0 = pnand %p762_p11, %p1182_p13 }
 0x1f4   : > { %p756_p6 = pneg %p755_p0 }
 0x1f6   : > { %944 = dma.done.wait (%p756_p6), %s553_s29, 128  }
 0x1f7   : > { %946 = vsyncadd (%p756_p6), %s553_s29, 4294967168  ;;  %s20_s23 = sadd.s32 1, %s969_s23   ;;  %s1183_s18 = smov %s953_s19 }
 0x1f8   : > { %p17_p7 = scmp.ge.s32.totalorder %s20_s23, 4   ;;  %s1184_s19 = smov %s957_s20 }
 0x1f9   : > { %s1185_s20 = smov %s1061_s6  ;;  %s1186_s21 = smov %s965_s22 }
 0x1fa   : > { %s1187_s22 = smov %s1189_s26  ;;  %19 = sbr.rel (!%p17_p7) target bundleno = 6 (0x6), region = 93 }
 0x1ff   :  { %558 = vsyncpa [#allocation3], 1 }
 0x200   :  { %560 = vsyncpa [#allocation3 + $0x1], 1 }
 0x201   :  { %561 = vsyncpa [#allocation6], 1 }
 0x202   :  { %562 = vsyncpa [#allocation4], 1 }
 0x203   :  { %564 = vsyncpa [#allocation4 + $0x1], 1 }

</bundles_post_ra>
